<compile_context>
chip_gen: v6e
topology: v6e:2x2x1
jax: 0.10.0
libtpu: 0.0.40
codegen_flags: <defaults>
</compile_context>

<pallas_src>
import jax
import jax.numpy as jnp
from jax.experimental import pallas as pl
from jax.experimental.pallas import tpu as pltpu


def lora_kernel(xt_ref, w_ref, b_ref, w2t_ref, ot_ref):
    """Transposed (batch-on-lanes) fused LoRA forward.

    xt_ref : [F_in, tb]       x^T tile (batch on the 128-lane axis)
    w_ref  : [F_out+R, F_in]  fused weights [W_in | W1]^T (resident)
    b_ref  : [F_out+R, 1]     fused biases  [b_in | b1]^T (resident, f32)
    w2t_ref: [F_out, R]       LoRA-B weight W2^T (resident, f32)
    ot_ref : [F_out, tb]      lane-dense output tile
    """
    f_out, r = w2t_ref.shape

    # One MXU pass for both the base projection and the pre-ReLU LoRA hidden.
    z = jnp.dot(w_ref[...], xt_ref[...],
                preferred_element_type=jnp.float32)          # [F_out+R, tb]
    # Bias add in-kernel (VPU broadcast over lanes) instead of an x ones-column.
    z = z + b_ref[...]

    base = z[:f_out, :]                                      # [F_out, tb]
    h = jnp.maximum(z[f_out:f_out + r, :], 0.0)              # [R, tb], ReLU
    # (Dropout(0.1) = identity in eval mode.)

    # Rank-R (R=2) projection on the VPU: two broadcast FMAs instead of a
    # second, mostly-empty MXU pass.
    w2t = w2t_ref[...]
    lora = w2t[:, 0:1] * h[0:1, :]
    for i in range(1, r):
        lora = lora + w2t[:, i:i + 1] * h[i:i + 1, :]

    ot_ref[...] = (base + lora).astype(ot_ref.dtype)


def _pick_batch_tile(batch, block_b):
    """Batch (lane) tile: multiple of 128 (or the full batch).  When there is
    enough work, size it so the grid has >= 2 steps (v7x has 2 TensorCores);
    harmless on v5e/v6e."""
    if batch <= block_b:
        if batch > 4096:
            half = -(-batch // 2)                  # ceil(batch / 2)
            return -(-half // 128) * 128           # round up to lane multiple
        return batch
    return block_b


def lora_forward(x, w_in, b_in, w1, b1, w2, *, block_b=32768,
                 compute_dtype=jnp.float32):
    """Fused LoRA forward: (x @ W_in + b_in) + relu(x @ W1 + b1) @ W2.

    x: [B, F_in]; weights stored as [in, out]; biases as [1, out].
    Internally computed in the transposed (batch-on-lanes) layout and
    transposed back to [B, F_out] for the caller.
    """
    B, f_in = x.shape
    f_out = w_in.shape[1]
    r = w1.shape[1]

    # --- tiny one-off weight prep -------------------------------------------
    w_cat_t = jnp.concatenate([w_in, w1], axis=1).T.astype(compute_dtype)  # [F_out+R, F_in]
    b_cat_t = jnp.concatenate([b_in, b1], axis=1).T.astype(jnp.float32)    # [F_out+R, 1]
    w2_t = w2.T.astype(jnp.float32)                                        # [F_out, R]

    # Batch on the lane axis.  (Ideally the producer already emits x in this
    # layout; the kernel consumes/produces [F, B] tiles.)
    x_t = x.T.astype(compute_dtype)

    tb = _pick_batch_tile(B, block_b)
    grid_b = pl.cdiv(B, tb)   # ragged last tile clipped by Pallas (no jnp.pad)

    out_t = pl.pallas_call(
        lora_kernel,
        out_shape=jax.ShapeDtypeStruct((f_out, B), x.dtype),
        grid=(grid_b,),
        in_specs=[
            # x^T: tiled over batch lanes.
            pl.BlockSpec((f_in, tb), lambda i: (0, i)),
            # Fused weights / biases / W2^T: resident across all grid steps.
            pl.BlockSpec((f_out + r, f_in), lambda i: (0, 0)),
            pl.BlockSpec((f_out + r, 1), lambda i: (0, 0)),
            pl.BlockSpec((f_out, r), lambda i: (0, 0)),
        ],
        # Lane-dense output tile (full 128-lane unmasked stores).
        out_specs=pl.BlockSpec((f_out, tb), lambda i: (0, i)),
        compiler_params=pltpu.CompilerParams(
            # Batch axis is embarrassingly parallel -> shards across the two
            # TensorCores on v7x; harmless on v5e/v6e.
            dimension_semantics=("parallel",)),
    )(x_t, w_cat_t, b_cat_t, w2_t)

    return out_t.T


def reference_forward(x, w_in, b_in, w1, b1, w2):
    base = x @ w_in + b_in
    h = jnp.maximum(x @ w1 + b1, 0.0)
    return base + h @ w2


if __name__ == "__main__":
    key = jax.random.PRNGKey(0)
    k_x, k_win, k_bin, k_w1, k_b1, k_w2, k_x2 = jax.random.split(key, 7)

    B, F_IN, F_OUT, R = 8, 10, 5, 2

    # Deterministic parameters (shapes match torch.nn.Linear, stored
    # pre-transposed as [in, out]).
    x = jax.random.normal(k_x, (B, F_IN), dtype=jnp.float32)
    w_in = jax.random.normal(k_win, (F_IN, F_OUT), dtype=jnp.float32) * 0.1
    b_in = jax.random.normal(k_bin, (1, F_OUT), dtype=jnp.float32) * 0.1
    w1 = jax.random.normal(k_w1, (F_IN, R), dtype=jnp.float32) * 0.1
    b1 = jax.random.normal(k_b1, (1, R), dtype=jnp.float32) * 0.1
    w2 = jax.random.normal(k_w2, (R, F_OUT), dtype=jnp.float32) * 0.1

    # --- f32 path, single tile: strict check --------------------------------
    out = jax.block_until_ready(lora_forward(x, w_in, b_in, w1, b1, w2))
    ref = reference_forward(x, w_in, b_in, w1, b1, w2)
    assert out.shape == (B, F_OUT)
    assert jnp.allclose(out, ref, atol=1e-5, rtol=1e-5)

    # --- bf16-input path, multi-tile grid with ragged last tile -------------
    B2 = 300
    x2 = jax.random.normal(k_x2, (B2, F_IN), dtype=jnp.float32)
    out2 = jax.block_until_ready(
        lora_forward(x2, w_in, b_in, w1, b1, w2,
                     block_b=128, compute_dtype=jnp.bfloat16))
    ref2 = reference_forward(x2, w_in, b_in, w1, b1, w2)
    assert out2.shape == (B2, F_OUT)
    assert jnp.allclose(out2, ref2, atol=1e-1, rtol=1e-1)  # bf16 inputs, f32 accum

    print("KERNEL_OK")
</pallas_src>

<mosaic_0001>
module attributes {stable_mosaic.version = 11 : i64} {
  func.func @lora_kernel(%arg0: i32, %arg1: memref<10x8xf32, #tpu.memory_space<vmem>>, %arg2: memref<7x10xf32, #tpu.memory_space<vmem>>, %arg3: memref<7x1xf32, #tpu.memory_space<vmem>>, %arg4: memref<5x2xf32, #tpu.memory_space<vmem>>, %arg5: memref<5x8xf32, #tpu.memory_space<vmem>>) attributes {dimension_semantics = [#tpu.dimension_semantics<parallel>], iteration_bounds = array<i64: 1>, scalar_prefetch = 0 : i64, scratch_operands = 0 : i64, tpu.core_type = #tpu.core_type<tc>, window_params = [{transform_indices = @transform_0, window_bounds = array<i64: 10, 8>}, {pipeline_mode = #tpu.pipeline_mode<synchronous>, transform_indices = @transform_1, window_bounds = array<i64: 7, 10>}, {pipeline_mode = #tpu.pipeline_mode<synchronous>, transform_indices = @transform_2, window_bounds = array<i64: 7, 1>}, {pipeline_mode = #tpu.pipeline_mode<synchronous>, transform_indices = @transform_3, window_bounds = array<i64: 5, 2>}, {transform_indices = @transform_4, window_bounds = array<i64: 5, 8>}]} {
    %c0 = arith.constant 0 : index
    %c0_0 = arith.constant 0 : index
    %0 = vector.load %arg2[%c0, %c0_0] : memref<7x10xf32, #tpu.memory_space<vmem>>, vector<7x10xf32>
    %c0_1 = arith.constant 0 : index
    %c0_2 = arith.constant 0 : index
    %1 = vector.load %arg1[%c0_1, %c0_2] : memref<10x8xf32, #tpu.memory_space<vmem>>, vector<10x8xf32>
    %cst = arith.constant dense<0.000000e+00> : vector<7x8xf32>
    %2 = tpu.matmul %0, %1, %cst {dimension_numbers = #tpu.dot_dimension_numbers<[1], [0], [0], [1], [0, 0, 1, 1], [], []>} : vector<7x10xf32>, vector<10x8xf32>, vector<7x8xf32> -> vector<7x8xf32>
    %c0_3 = arith.constant 0 : index
    %c0_4 = arith.constant 0 : index
    %3 = vector.load %arg3[%c0_3, %c0_4] : memref<7x1xf32, #tpu.memory_space<vmem>>, vector<7x1xf32>
    %4 = vector.broadcast %3 : vector<7x1xf32> to vector<7x8xf32>
    %5 = arith.addf %2, %4 : vector<7x8xf32>
    %6 = vector.extract_strided_slice %5 {offsets = [0, 0], sizes = [5, 8], strides = [1, 1]} : vector<7x8xf32> to vector<5x8xf32>
    %7 = vector.extract_strided_slice %5 {offsets = [5, 0], sizes = [2, 8], strides = [1, 1]} : vector<7x8xf32> to vector<2x8xf32>
    %cst_5 = arith.constant 0.000000e+00 : f32
    %8 = vector.broadcast %cst_5 : f32 to vector<2x8xf32>
    %9 = arith.maximumf %7, %8 : vector<2x8xf32>
    %c0_6 = arith.constant 0 : index
    %c0_7 = arith.constant 0 : index
    %10 = vector.load %arg4[%c0_6, %c0_7] : memref<5x2xf32, #tpu.memory_space<vmem>>, vector<5x2xf32>
    %11 = vector.extract_strided_slice %10 {offsets = [0, 0], sizes = [5, 1], strides = [1, 1]} : vector<5x2xf32> to vector<5x1xf32>
    %12 = vector.extract_strided_slice %9 {offsets = [0, 0], sizes = [1, 8], strides = [1, 1]} : vector<2x8xf32> to vector<1x8xf32>
    %13 = vector.broadcast %11 : vector<5x1xf32> to vector<5x8xf32>
    %14 = vector.broadcast %12 : vector<1x8xf32> to vector<5x8xf32>
    %15 = arith.mulf %13, %14 : vector<5x8xf32>
    %16 = vector.extract_strided_slice %10 {offsets = [0, 1], sizes = [5, 1], strides = [1, 1]} : vector<5x2xf32> to vector<5x1xf32>
    %17 = vector.extract_strided_slice %9 {offsets = [1, 0], sizes = [1, 8], strides = [1, 1]} : vector<2x8xf32> to vector<1x8xf32>
    %18 = vector.broadcast %16 : vector<5x1xf32> to vector<5x8xf32>
    %19 = vector.broadcast %17 : vector<1x8xf32> to vector<5x8xf32>
    %20 = arith.mulf %18, %19 : vector<5x8xf32>
    %21 = arith.addf %15, %20 : vector<5x8xf32>
    %22 = arith.addf %6, %21 : vector<5x8xf32>
    %c0_8 = arith.constant 0 : index
    %c0_9 = arith.constant 0 : index
    %23 = vector.load %arg5[%c0_8, %c0_9] : memref<5x8xf32, #tpu.memory_space<vmem>>, vector<5x8xf32>
    tpu.vector_store %arg5[%c0_8, %c0_9], %22 {strides = array<i32>} : memref<5x8xf32, #tpu.memory_space<vmem>>, vector<5x8xf32>,
    return
  }
  func.func @transform_0(%arg0: i32) -> (i32, i32) {
    %c0_i32 = arith.constant 0 : i32
    %c0_i32_0 = arith.constant 0 : i32
    return %c0_i32, %arg0 : i32, i32
  }
  func.func @transform_1(%arg0: i32) -> (i32, i32) {
    %c0_i32 = arith.constant 0 : i32
    %c0_i32_0 = arith.constant 0 : i32
    %c0_i32_1 = arith.constant 0 : i32
    return %c0_i32, %c0_i32_0 : i32, i32
  }
  func.func @transform_2(%arg0: i32) -> (i32, i32) {
    %c0_i32 = arith.constant 0 : i32
    %c0_i32_0 = arith.constant 0 : i32
    %c0_i32_1 = arith.constant 0 : i32
    return %c0_i32, %c0_i32_0 : i32, i32
  }
  func.func @transform_3(%arg0: i32) -> (i32, i32) {
    %c0_i32 = arith.constant 0 : i32
    %c0_i32_0 = arith.constant 0 : i32
    %c0_i32_1 = arith.constant 0 : i32
    return %c0_i32, %c0_i32_0 : i32, i32
  }
  func.func @transform_4(%arg0: i32) -> (i32, i32) {
    %c0_i32 = arith.constant 0 : i32
    %c0_i32_0 = arith.constant 0 : i32
    return %c0_i32, %arg0 : i32, i32
  }
}

</mosaic_0001>

<bundles_post_ra>
// kernel: tpu_custom_call.1
= control target key start
LH: loop header
LB: loop body
LE: loop exit
PB: predicated region body
PF: predicated region fallthrough
CT: control target
= control target key end

     0   :  { %vm31_vm0 = vcmask 1041408   ;;  %v186_v1 = vmov 0.0   ;;  %vm187_vm1 = vmmov 0   ;;  %vm27_vm2 = vcmask 80896   ;;  %s234_s0 = inlined_call_operand.vmem [shape: f32[10,8], index: 0, kind: input, shape index: {}]   ;;  %s235_s1 = inlined_call_operand.vmem [shape: f32[7,10], index: 1, kind: input, shape index: {}]   ;;  %s236_s2 = inlined_call_operand.vmem [shape: f32[7,1], index: 2, kind: input, shape index: {}]   ;;  %s237_s3 = inlined_call_operand.vmem [shape: f32[5,2], index: 3, kind: input, shape index: {}]   ;;  %s238_s4 = inlined_call_operand.hbm [shape: f32[5,8], index: 4, kind: output, shape index: {}]  }
   0x1   :  { %v20_v0 = vld [vmem:[%s234_s0 + $0x8] sm:$0x3]  ;;  %149 = vmatprep.subr.mxu0 %v186_v1  ;;  %v19_v2 = vld [vmem:[%s234_s0] sm:$0xff]  ;;  %153 = vmatprep.mubr.msk.f32.mxu0 %vm187_vm1, %v186_v1  ;;  %v188_v5 = vmov 0  }
   0x2   :  { %v21_v3 = vld [vmem:[%s236_s2] sm:$0x7f]  ;;  %150 = vmatpush3.msk.msra.mxu0 %vm31_vm0, %v20_v0  ;;  %161 = vset.pattern.permute.xlu0 %v188_v5 }
   0x3   :  { %v18_v4 = vld [vmem:[%s235_s1] sm:$0x7f] }
   0x4   :  { %9 = vsyncpa [#allocation3], 0  ;;  %151 = vmatprep.subr.mxu0 %v186_v1  ;;  %24 = vperm.xlu0 %161, %v21_v3   ;;  %v106_v6 = vld [vmem:[%s237_s3] sm:$0x1f]  ;;  %v189_v7 = vmov 1   ;;  %v112_v8 = vlaneseq  ;;  %s190_s1 = smov [#allocation2]  }
   0x5   :  { %152 = vmatpush3.msra.mxu0 %v19_v2  ;;  %162 = vset.pattern.permute.xlu1 %v189_v7  ;;  %s136_s2 = sshll.u32 %s190_s1, 4  ;;  %vm128_vm3 = vcmask 61440   ;;  %s137_s2 = int_to_ptr.vmem [resolvable:$true] %s136_s2 }
   0x6   :  { %154 = vmatmul.mubr.msk.f32.vlgmr.msra.gmra.mxu0 %vm27_vm2, %v18_v4  ;;  %118 = vperm.xlu1 %162, %v106_v6   ;;  %v113_v9 = vshrl.u32 %v112_v8, 7  ;;  %s164_s3 = scalar_lea.vmem %s137_s2, 128  ;;  %p169_p1 = scmp.lt.s32.totalorder %s137_s2, %s137_s2 }
   0x7   :  { %p165_p0 = scmp.ne.s32.totalorder %s137_s2, %s164_s3  ;;  %p170_p2 = scmp.lt.s32.totalorder %s164_s3, %s164_s3 }
   0x8   :  { %109 = vperm.xlu0 %161, %v106_v6   ;;  %v114_v13 = vsub.s32 5, %v113_v9  ;;  %v123_v14 = vsub.s32 6, %v113_v9 }
   0x9   :  { %p171_p3 = por %p170_p2, %p169_p1 }
   0xb   :  { %p172_p4 = pnand %p171_p3, %p165_p0 }
   0xc   :  { %163 = vset.pattern.permute.xlu0 %v189_v7 }
  0x7f   :  { %v25_v10 = vpop.permute.xlu0 %24 }
  0x81   :  { %v119_v17 = vpop.permute.xlu1 %118 }
  0x83   :  { %v110_v20 = vpop.permute.xlu0 %109 }
  0xc6   :  { %v101_v11 = vpop.f32.mrf.mxu0 }
  0xc7   :  { %v102_v12 = vadd.f32 %v101_v11, %v25_v10 }
  0xc8   :  { %v155_v15 = vpop.f32.mrf.mxu0 }
  0xc9   :  { %v105_v16 = vmax.f32 %v102_v12, 0.0 }
  0xcb   :  { %v115_v18 = vrot.slane %v105_v16, %v114_v13  ;;  %v124_v19 = vrot.slane %v105_v16, %v123_v14 }
  0xcd   :  { %v116_v21 = vmul.f32 %v115_v18, %v110_v20  ;;  %v125_v22 = vmul.f32 %v124_v19, %v119_v17 }
  0xcf   :  { %v126_v23 = vadd.f32 %v125_v22, %v116_v21 }
  0xd1   :  { %v127_v24 = vadd.f32 %v126_v23, %v102_v12 }
  0xd3   :  { %129 = vst.msk [vmem:[#allocation2] sm:$0x1f] %vm128_vm3, %v127_v24 }
  0xd4   :  { %175 = shalt.err (!%p172_p4)
}
  0xd5   :  { %139 = dma.vmem_to_hbm [thread:$0]  %s137_s2, 128, %s238_s4, [#allocation3]  }
  0xd6   :  { %184 = dma.done.wait [#allocation3], 128  }
  0xd7   :  { %185 = vsyncadd [#allocation3], 4294967168 }
  0xd8   :  { %143 = vsyncpa [#allocation3], 1 }

</bundles_post_ra>
